<compile_context>
chip_gen: v5e
topology: v5e:2x2
jax: 0.10.0
libtpu: 0.0.40
codegen_flags: <defaults>
</compile_context>

<pallas_src>
import functools

import jax
import jax.numpy as jnp
from jax.experimental import pallas as pl
from jax.experimental.pallas import tpu as pltpu

LEAKY_SLOPE = 0.01   # nn.LeakyReLU default negative_slope
LN_EPS = 1e-5        # nn.LayerNorm default eps


def mlp_kernel(x_ref, w1_ref, b1_ref, g_ref, beta_ref, w2_ref, b2_ref, o_ref):
    # ---- Linear 1: bf16 operands on the MXU, f32 accumulation ----
    h = jnp.dot(x_ref[...], w1_ref[...], preferred_element_type=jnp.float32)
    h = h + b1_ref[...]                                   # (TB, H) f32

    # ---- LayerNorm over last dim (biased variance, like torch), all in f32 ----
    mean = jnp.mean(h, axis=-1, keepdims=True)
    diff = h - mean
    var = jnp.mean(diff * diff, axis=-1, keepdims=True)
    hn = diff * jax.lax.rsqrt(var + LN_EPS)
    hn = hn * g_ref[...] + beta_ref[...]

    # ---- LeakyReLU (f32, VPU) ----
    hn = jnp.where(hn >= 0, hn, LEAKY_SLOPE * hn)

    # ---- Dropout: identity in inference mode ----
    # TODO(synk): training-mode dropout (pltpu.prng_seed/prng_random_bits mask * 1/(1-p))
    #             not implemented; eval semantics used.

    # ---- Linear 2: back to bf16 for the MXU, f32 accumulation ----
    y = jnp.dot(hn.astype(jnp.bfloat16), w2_ref[...],
                preferred_element_type=jnp.float32)
    y = y + b2_ref[...]
    o_ref[...] = y.astype(o_ref.dtype)


def _round_up(x, m):
    return ((x + m - 1) // m) * m


@functools.partial(jax.jit, static_argnames=())
def mlp_forward(x, w1, b1, gamma, beta, w2, b2):
    """x: (B, Din) f32; w1: (Din, H); w2: (H, Dout); b1/gamma/beta: (H,); b2: (Dout,)."""
    B, Din = x.shape
    H = w1.shape[1]
    Dout = w2.shape[1]

    # --- tile / padding choices -------------------------------------------------
    # Batch tile: 256 rows (MXU-height multiple on all generations); for small B use a
    # single 8-aligned tile.  VMEM footprint here is tiny relative to the 32 MiB scoped
    # default, so no explicit vmem_limit_bytes is needed at these sizes.
    TB = 256 if B >= 256 else max(8, _round_up(B, 8))
    Bp = _round_up(B, TB)
    # Lane-dense output: pad Dout up to a multiple of 128.
    Dp = _round_up(Dout, 128)

    # --- operand preparation (bf16 for MXU operands, f32 for small per-feature vecs) ---
    x_p = x.astype(jnp.bfloat16)
    if Bp != B:
        x_p = jnp.pad(x_p, ((0, Bp - B), (0, 0)))
    w1_b = w1.astype(jnp.bfloat16)
    w2_b = w2.astype(jnp.bfloat16)
    if Dp != Dout:
        w2_b = jnp.pad(w2_b, ((0, 0), (0, Dp - Dout)))
        b2_p = jnp.pad(b2, ((0, Dp - Dout),))
    else:
        b2_p = b2

    b1_2d = b1.reshape(1, H).astype(jnp.float32)
    g_2d = gamma.reshape(1, H).astype(jnp.float32)
    be_2d = beta.reshape(1, H).astype(jnp.float32)
    b2_2d = b2_p.reshape(1, Dp).astype(jnp.float32)

    grid = (Bp // TB,)

    cost = pl.CostEstimate(
        flops=2 * Bp * (Din * H + H * Dp),
        transcendentals=Bp,  # one rsqrt per row
        bytes_accessed=(Bp * Din * 2 + Din * H * 2 + H * Dp * 2
                        + Bp * Dp * 4 + 3 * H * 4 + Dp * 4),
    )

    out_p = pl.pallas_call(
        mlp_kernel,
        out_shape=jax.ShapeDtypeStruct((Bp, Dp), jnp.float32),
        grid=grid,
        in_specs=[
            pl.BlockSpec((TB, Din), lambda i: (i, 0)),   # x: tiled over batch
            pl.BlockSpec((Din, H), lambda i: (0, 0)),    # w1: VMEM-resident
            pl.BlockSpec((1, H), lambda i: (0, 0)),      # b1
            pl.BlockSpec((1, H), lambda i: (0, 0)),      # gamma
            pl.BlockSpec((1, H), lambda i: (0, 0)),      # beta
            pl.BlockSpec((H, Dp), lambda i: (0, 0)),     # w2 (lane-padded)
            pl.BlockSpec((1, Dp), lambda i: (0, 0)),     # b2 (lane-padded)
        ],
        out_specs=pl.BlockSpec((TB, Dp), lambda i: (i, 0)),
        compiler_params=pltpu.CompilerParams(
            dimension_semantics=("parallel",)),
        cost_estimate=cost,
    )(x_p, w1_b, b1_2d, g_2d, be_2d, w2_b, b2_2d)

    # Strip batch / lane padding.
    return out_p[:B, :Dout]


def reference_mlp(x, w1, b1, gamma, beta, w2, b2):
    # Same numerics as the kernel: bf16 matmul operands, f32 accumulation, f32 LN math.
    h = jnp.dot(x.astype(jnp.bfloat16), w1.astype(jnp.bfloat16),
                preferred_element_type=jnp.float32) + b1
    mean = h.mean(-1, keepdims=True)
    diff = h - mean
    var = (diff * diff).mean(-1, keepdims=True)
    hn = diff * jax.lax.rsqrt(var + LN_EPS) * gamma + beta
    hn = jnp.where(hn >= 0, hn, LEAKY_SLOPE * hn)
    return jnp.dot(hn.astype(jnp.bfloat16), w2.astype(jnp.bfloat16),
                   preferred_element_type=jnp.float32) + b2


if __name__ == "__main__":
    # Shapes consistent with MLP(input_dim=64, output_dim=32, hidden_dims=(256,)).
    B, Din, H, Dout = 16, 64, 256, 32

    key = jax.random.PRNGKey(0)
    kx, k1, k2, k3, k4 = jax.random.split(key, 5)

    x = jax.random.normal(kx, (B, Din), dtype=jnp.float32)

    # Deterministic "torch-like" uniform init: U(-1/sqrt(fan_in), 1/sqrt(fan_in))
    lim1 = 1.0 / (Din ** 0.5)
    w1 = jax.random.uniform(k1, (Din, H), minval=-lim1, maxval=lim1, dtype=jnp.float32)
    b1 = jax.random.uniform(k2, (H,), minval=-lim1, maxval=lim1, dtype=jnp.float32)
    gamma = jnp.ones((H,), jnp.float32)
    beta = jnp.zeros((H,), jnp.float32)
    lim2 = 1.0 / (H ** 0.5)
    w2 = jax.random.uniform(k3, (H, Dout), minval=-lim2, maxval=lim2, dtype=jnp.float32)
    b2 = jax.random.uniform(k4, (Dout,), minval=-lim2, maxval=lim2, dtype=jnp.float32)

    out = mlp_forward(x, w1, b1, gamma, beta, w2, b2)
    out = jax.block_until_ready(out)

    ref = reference_mlp(x, w1, b1, gamma, beta, w2, b2)
    assert out.shape == (B, Dout)
    assert jnp.allclose(out, ref, atol=5e-3, rtol=5e-3), "mismatch vs JAX reference"

    print("KERNEL_OK")
</pallas_src>

<mosaic_0001>
module attributes {stable_mosaic.version = 11 : i64} {
  func.func @mlp_kernel(%arg0: i32, %arg1: memref<16x64xbf16, #tpu.memory_space<vmem>>, %arg2: memref<64x256xbf16, #tpu.memory_space<vmem>>, %arg3: memref<1x256xf32, #tpu.memory_space<vmem>>, %arg4: memref<1x256xf32, #tpu.memory_space<vmem>>, %arg5: memref<1x256xf32, #tpu.memory_space<vmem>>, %arg6: memref<256x128xbf16, #tpu.memory_space<vmem>>, %arg7: memref<1x128xf32, #tpu.memory_space<vmem>>, %arg8: memref<16x128xf32, #tpu.memory_space<vmem>>) attributes {dimension_semantics = [#tpu.dimension_semantics<parallel>], iteration_bounds = array<i64: 1>, scalar_prefetch = 0 : i64, scratch_operands = 0 : i64, tpu.core_type = #tpu.core_type<tc>, window_params = [{transform_indices = @transform_0, window_bounds = array<i64: 16, 64>}, {pipeline_mode = #tpu.pipeline_mode<synchronous>, transform_indices = @transform_1, window_bounds = array<i64: 64, 256>}, {pipeline_mode = #tpu.pipeline_mode<synchronous>, transform_indices = @transform_2, window_bounds = array<i64: 1, 256>}, {pipeline_mode = #tpu.pipeline_mode<synchronous>, transform_indices = @transform_3, window_bounds = array<i64: 1, 256>}, {pipeline_mode = #tpu.pipeline_mode<synchronous>, transform_indices = @transform_4, window_bounds = array<i64: 1, 256>}, {pipeline_mode = #tpu.pipeline_mode<synchronous>, transform_indices = @transform_5, window_bounds = array<i64: 256, 128>}, {pipeline_mode = #tpu.pipeline_mode<synchronous>, transform_indices = @transform_6, window_bounds = array<i64: 1, 128>}, {transform_indices = @transform_7, window_bounds = array<i64: 16, 128>}]} {
    %c0 = arith.constant 0 : index
    %c0_0 = arith.constant 0 : index
    %0 = vector.load %arg1[%c0, %c0_0] : memref<16x64xbf16, #tpu.memory_space<vmem>>, vector<16x64xbf16>
    %c0_1 = arith.constant 0 : index
    %c0_2 = arith.constant 0 : index
    %1 = vector.load %arg2[%c0_1, %c0_2] : memref<64x256xbf16, #tpu.memory_space<vmem>>, vector<64x256xbf16>
    %cst = arith.constant dense<0.000000e+00> : vector<16x256xf32>
    %2 = tpu.matmul %0, %1, %cst {dimension_numbers = #tpu.dot_dimension_numbers<[1], [0], [0], [1], [0, 0, 1, 1], [], []>} : vector<16x64xbf16>, vector<64x256xbf16>, vector<16x256xf32> -> vector<16x256xf32>
    %c0_3 = arith.constant 0 : index
    %c0_4 = arith.constant 0 : index
    %3 = vector.load %arg3[%c0_3, %c0_4] : memref<1x256xf32, #tpu.memory_space<vmem>>, vector<1x256xf32>
    %4 = vector.broadcast %3 : vector<1x256xf32> to vector<16x256xf32>
    %5 = arith.addf %2, %4 : vector<16x256xf32>
    %cst_5 = arith.constant dense<0.000000e+00> : vector<16xf32>
    %6 = vector.multi_reduction <add>, %5, %cst_5 [1] : vector<16x256xf32> to vector<16xf32>
    %7 = vector.shape_cast %6 : vector<16xf32> to vector<16x1xf32>
    %cst_6 = arith.constant 2.560000e+02 : f32
    %8 = vector.broadcast %cst_6 : f32 to vector<16x1xf32>
    %9 = arith.divf %7, %8 : vector<16x1xf32>
    %10 = vector.broadcast %9 : vector<16x1xf32> to vector<16x256xf32>
    %11 = arith.subf %5, %10 : vector<16x256xf32>
    %12 = arith.mulf %11, %11 : vector<16x256xf32>
    %cst_7 = arith.constant dense<0.000000e+00> : vector<16xf32>
    %13 = vector.multi_reduction <add>, %12, %cst_7 [1] : vector<16x256xf32> to vector<16xf32>
    %14 = vector.shape_cast %13 : vector<16xf32> to vector<16x1xf32>
    %cst_8 = arith.constant 2.560000e+02 : f32
    %15 = vector.broadcast %cst_8 : f32 to vector<16x1xf32>
    %16 = arith.divf %14, %15 : vector<16x1xf32>
    %cst_9 = arith.constant 9.99999974E-6 : f32
    %17 = vector.broadcast %cst_9 : f32 to vector<16x1xf32>
    %18 = arith.addf %16, %17 : vector<16x1xf32>
    %19 = math.rsqrt %18 : vector<16x1xf32>
    %20 = vector.broadcast %19 : vector<16x1xf32> to vector<16x256xf32>
    %21 = arith.mulf %11, %20 : vector<16x256xf32>
    %c0_10 = arith.constant 0 : index
    %c0_11 = arith.constant 0 : index
    %22 = vector.load %arg4[%c0_10, %c0_11] : memref<1x256xf32, #tpu.memory_space<vmem>>, vector<1x256xf32>
    %23 = vector.broadcast %22 : vector<1x256xf32> to vector<16x256xf32>
    %24 = arith.mulf %21, %23 : vector<16x256xf32>
    %c0_12 = arith.constant 0 : index
    %c0_13 = arith.constant 0 : index
    %25 = vector.load %arg5[%c0_12, %c0_13] : memref<1x256xf32, #tpu.memory_space<vmem>>, vector<1x256xf32>
    %26 = vector.broadcast %25 : vector<1x256xf32> to vector<16x256xf32>
    %27 = arith.addf %24, %26 : vector<16x256xf32>
    %cst_14 = arith.constant 0.000000e+00 : f32
    %28 = vector.broadcast %cst_14 : f32 to vector<16x256xf32>
    %29 = arith.cmpf oge, %27, %28 : vector<16x256xf32>
    %cst_15 = arith.constant 0.00999999977 : f32
    %30 = vector.broadcast %cst_15 : f32 to vector<16x256xf32>
    %31 = arith.mulf %30, %27 : vector<16x256xf32>
    %32 = arith.select %29, %27, %31 : vector<16x256xi1>, vector<16x256xf32>
    %33 = arith.truncf %32 : vector<16x256xf32> to vector<16x256xbf16>
    %c0_16 = arith.constant 0 : index
    %c0_17 = arith.constant 0 : index
    %34 = vector.load %arg6[%c0_16, %c0_17] : memref<256x128xbf16, #tpu.memory_space<vmem>>, vector<256x128xbf16>
    %cst_18 = arith.constant dense<0.000000e+00> : vector<16x128xf32>
    %35 = tpu.matmul %33, %34, %cst_18 {dimension_numbers = #tpu.dot_dimension_numbers<[1], [0], [0], [1], [0, 0, 1, 1], [], []>} : vector<16x256xbf16>, vector<256x128xbf16>, vector<16x128xf32> -> vector<16x128xf32>
    %c0_19 = arith.constant 0 : index
    %c0_20 = arith.constant 0 : index
    %36 = vector.load %arg7[%c0_19, %c0_20] : memref<1x128xf32, #tpu.memory_space<vmem>>, vector<1x128xf32>
    %37 = vector.broadcast %36 : vector<1x128xf32> to vector<16x128xf32>
    %38 = arith.addf %35, %37 : vector<16x128xf32>
    %c0_21 = arith.constant 0 : index
    %c0_22 = arith.constant 0 : index
    %39 = vector.load %arg8[%c0_21, %c0_22] : memref<16x128xf32, #tpu.memory_space<vmem>>, vector<16x128xf32>
    tpu.vector_store %arg8[%c0_21, %c0_22], %38 {strides = array<i32>} : memref<16x128xf32, #tpu.memory_space<vmem>>, vector<16x128xf32>,
    return
  }
  func.func @transform_0(%arg0: i32) -> (i32, i32) {
    %c0_i32 = arith.constant 0 : i32
    %c0_i32_0 = arith.constant 0 : i32
    return %arg0, %c0_i32 : i32, i32
  }
  func.func @transform_1(%arg0: i32) -> (i32, i32) {
    %c0_i32 = arith.constant 0 : i32
    %c0_i32_0 = arith.constant 0 : i32
    %c0_i32_1 = arith.constant 0 : i32
    return %c0_i32, %c0_i32_0 : i32, i32
  }
  func.func @transform_2(%arg0: i32) -> (i32, i32) {
    %c0_i32 = arith.constant 0 : i32
    %c0_i32_0 = arith.constant 0 : i32
    %c0_i32_1 = arith.constant 0 : i32
    return %c0_i32, %c0_i32_0 : i32, i32
  }
  func.func @transform_3(%arg0: i32) -> (i32, i32) {
    %c0_i32 = arith.constant 0 : i32
    %c0_i32_0 = arith.constant 0 : i32
    %c0_i32_1 = arith.constant 0 : i32
    return %c0_i32, %c0_i32_0 : i32, i32
  }
  func.func @transform_4(%arg0: i32) -> (i32, i32) {
    %c0_i32 = arith.constant 0 : i32
    %c0_i32_0 = arith.constant 0 : i32
    %c0_i32_1 = arith.constant 0 : i32
    return %c0_i32, %c0_i32_0 : i32, i32
  }
  func.func @transform_5(%arg0: i32) -> (i32, i32) {
    %c0_i32 = arith.constant 0 : i32
    %c0_i32_0 = arith.constant 0 : i32
    %c0_i32_1 = arith.constant 0 : i32
    return %c0_i32, %c0_i32_0 : i32, i32
  }
  func.func @transform_6(%arg0: i32) -> (i32, i32) {
    %c0_i32 = arith.constant 0 : i32
    %c0_i32_0 = arith.constant 0 : i32
    %c0_i32_1 = arith.constant 0 : i32
    return %c0_i32, %c0_i32_0 : i32, i32
  }
  func.func @transform_7(%arg0: i32) -> (i32, i32) {
    %c0_i32 = arith.constant 0 : i32
    %c0_i32_0 = arith.constant 0 : i32
    return %arg0, %c0_i32 : i32, i32
  }
}

</mosaic_0001>

<bundles_post_ra>
// kernel: mlp_forward.1
= control target key start
LH: loop header
LB: loop body
LE: loop exit
PB: predicated region body
PF: predicated region fallthrough
CT: control target
= control target key end

     0   :  { %s734_s0 = inlined_call_operand.vmem [shape: bf16[16,64], index: 0, kind: input, shape index: {}]   ;;  %s735_s1 = inlined_call_operand.vmem [shape: bf16[64,256], index: 1, kind: input, shape index: {}]   ;;  %s736_s2 = inlined_call_operand.vmem [shape: f32[1,256], index: 2, kind: input, shape index: {}]   ;;  %s737_s3 = inlined_call_operand.vmem [shape: f32[1,256], index: 3, kind: input, shape index: {}]   ;;  %s738_s4 = inlined_call_operand.vmem [shape: f32[1,256], index: 4, kind: input, shape index: {}]   ;;  %s739_s5 = inlined_call_operand.vmem [shape: bf16[256,128], index: 5, kind: input, shape index: {}]   ;;  %s740_s6 = inlined_call_operand.vmem [shape: f32[1,128], index: 6, kind: input, shape index: {}]   ;;  %s741_s7 = inlined_call_operand.hbm [shape: f32[16,128], index: 7, kind: output, shape index: {}]  }
   0x1   :  { %v422_v0 = vld [vmem:[%s735_s1 + $0x30] sm:$0xf]  ;;  %v502_v1 = vld [vmem:[%s735_s1 + $0x34] sm:$0xf0]  ;;  %v501_v2 = vld [vmem:[%s735_s1 + $0x34] sm:$0xf] }
   0x2   :  { %v423_v3 = vor.u32 %v502_v1, %v422_v0  ;;  %v424_v4 = vld [vmem:[%s735_s1 + $0x38] sm:$0xf0]  ;;  %v414_v5 = vld [vmem:[%s735_s1 + $0x20] sm:$0xf]  ;;  %v500_v6 = vld [vmem:[%s735_s1 + $0x24] sm:$0xf0] }
   0x3   :  { %v427_v7 = vor.u32 %v501_v2, %v424_v4  ;;  %v499_v8 = vld [vmem:[%s735_s1 + $0x24] sm:$0xf]  ;;  %v416_v9 = vld [vmem:[%s735_s1 + $0x28] sm:$0xf0]  ;;  %v415_v10 = vor.u32 %v500_v6, %v414_v5  ;;  %v406_v12 = vld [vmem:[%s735_s1 + $0x10] sm:$0xf] }
   0x4   :  { %97 = vmatpush.bf16.msra.mxu0 %v423_v3  ;;  %v419_v11 = vor.u32 %v499_v8, %v416_v9  ;;  %v498_v13 = vld [vmem:[%s735_s1 + $0x14] sm:$0xf0]  ;;  %v497_v14 = vld [vmem:[%s735_s1 + $0x14] sm:$0xf]  ;;  %v408_v15 = vld [vmem:[%s735_s1 + $0x18] sm:$0xf0] }
   0x5   :  { %111 = vmatpush.bf16.msra.mxu1 %v427_v7 }
   0x6   :  { %12 = vsyncpa [#allocation3], 0  ;;  %v407_v16 = vor.u32 %v498_v13, %v406_v12  ;;  %v411_v17 = vor.u32 %v497_v14, %v408_v15  ;;  %v398_v18 = vld [vmem:[%s735_s1] sm:$0xf]  ;;  %v496_v19 = vld [vmem:[%s735_s1 + $0x4] sm:$0xf0] }
   0x7   :  { %v495_v20 = vld [vmem:[%s735_s1 + $0x4] sm:$0xf]  ;;  %v400_v21 = vld [vmem:[%s735_s1 + $0x8] sm:$0xf0]  ;;  %v399_v22 = vor.u32 %v496_v19, %v398_v18  ;;  %vm89_vm0 = vcmask 523264   ;;  %v556_v38 = vmov 256.0  }
   0x8   :  { %98 = vmatpush.bf16.msra.mxu0 %v415_v10  ;;  %v403_v23 = vor.u32 %v495_v20, %v400_v21  ;;  %v494_v24 = vld [vmem:[%s734_s0] sm:$0xff]  ;;  %524 = vrcp.f32 %v556_v38  ;;  %v510_v59 = vld [vmem:[%s739_s5 + $0x38] sm:$0xff]  ;;  %v509_v61 = vld [vmem:[%s739_s5 + $0x30] sm:$0xff]  ;;  %s557_s20 = smov [#allocation2]   ;;  %s380_s24 = sshll.u32 %s741_s7, 4  ;;  %s381_s24 = int_to_ptr.hbm [resolvable:$true] %s380_s24 }
   0x9   :  { %112 = vmatpush.bf16.msra.mxu1 %v419_v11  ;;  %v38_v25 = vld [vmem:[%s736_s2] sm:$0x3]  ;;  %v518_v60 = vld [vmem:[%s739_s5 + $0x78] sm:$0xff]  ;;  %344 = vmatpush.bf16.msra.mxu2 %v510_v59  ;;  %v517_v62 = vld [vmem:[%s739_s5 + $0x70] sm:$0xff]  ;;  %s378_s21 = sshll.u32 %s557_s20, 4  ;;  %s558_s25 = smov 128   ;;  %s379_s21 = int_to_ptr.vmem [resolvable:$true] %s378_s21 }
   0xa   :  { %v40_v26 = vperm.slane %v38_v25, 0  ;;  %v41_v27 = vperm.slane %v38_v25, 1  ;;  %358 = vmatpush.bf16.msra.mxu3 %v518_v60  ;;  %v508_v63 = vld [vmem:[%s739_s5 + $0x28] sm:$0xff]  ;;  %v507_v1 = vld [vmem:[%s739_s5 + $0x20] sm:$0xff]  ;;  %v506_v3 = vld [vmem:[%s739_s5 + $0x18] sm:$0xff] }
   0xb   :  { %v516_v0 = vld [vmem:[%s739_s5 + $0x68] sm:$0xff]  ;;  %v515_v2 = vld [vmem:[%s739_s5 + $0x60] sm:$0xff]  ;;  %v514_v4 = vld [vmem:[%s739_s5 + $0x58] sm:$0xff] }
   0xc   :  { %99 = vmatpush.bf16.msra.mxu0 %v407_v16  ;;  %v505_v5 = vld [vmem:[%s739_s5 + $0x10] sm:$0xff]  ;;  %v504_v7 = vld [vmem:[%s739_s5 + $0x8] sm:$0xff]  ;;  %v503_v12 = vld [vmem:[%s739_s5] sm:$0xff] }
   0xd   :  { %113 = vmatpush.bf16.msra.mxu1 %v411_v17  ;;  %345 = vmatpush.bf16.msra.mxu2 %v509_v61  ;;  %v513_v6 = vld [vmem:[%s739_s5 + $0x50] sm:$0xff]  ;;  %v512_v8 = vld [vmem:[%s739_s5 + $0x48] sm:$0xff]  ;;  %v511_v13 = vld [vmem:[%s739_s5 + $0x40] sm:$0xff] }
   0xe   :  { %v525_v39 = vpop.eup %524  ;;  %359 = vmatpush.bf16.msra.mxu3 %v517_v62  ;;  %v178_v25 = vld [vmem:[%s737_s3] sm:$0x3] }
   0xf   :  { %v128_v40 = vmul.f32 256.0, %v525_v39  ;;  %vm132_vm1 = vweird.f32 %v525_v39  ;;  %v523_v59 = vld [vmem:[%s740_s6] ss:$0 sm:$0xff]  ;;  %s559_s6 = smov 8  }
  0x10   :  { %100 = vmatpush.bf16.msra.mxu0 %v399_v22 }
  0x11   :  { %114 = vmatpush.bf16.msra.mxu1 %v403_v23  ;;  %v129_v41 = vsub.f32 1.0, %v128_v40  ;;  %346 = vmatpush.bf16.msra.mxu2 %v508_v63 }
  0x12   :  { %360 = vmatpush.bf16.msra.mxu3 %v516_v0 }
  0x13   :  { %428 = vmatmul.msk.bf16.vlgmr.msra.gmra.mxu0 %vm89_vm0, %v494_v24  ;;  %v130_v42 = vmul.f32 %v525_v39, %v129_v41 }
  0x14   :  { %429 = vmatmul.msk.bf16.vlgmr.msra.gmra.mxu1 %vm89_vm0, %v494_v24 }
  0x15   :  { %v131_v43 = vadd.f32 %v525_v39, %v130_v42  ;;  %347 = vmatpush.bf16.msra.mxu2 %v507_v1 }
  0x16   :  { %361 = vmatpush.bf16.msra.mxu3 %v515_v2 }
  0x17   :  { %v133_v44 = vsel %vm132_vm1, %v525_v39, %v131_v43 }
  0x19   :  { %348 = vmatpush.bf16.msra.mxu2 %v506_v3 }
  0x1a   :  { %362 = vmatpush.bf16.msra.mxu3 %v514_v4 }
  0x1d   :  { %349 = vmatpush.bf16.msra.mxu2 %v505_v5 }
  0x1e   :  { %363 = vmatpush.bf16.msra.mxu3 %v513_v6 }
  0x21   :  { %350 = vmatpush.bf16.msra.mxu2 %v504_v7 }
  0x22   :  { %364 = vmatpush.bf16.msra.mxu3 %v512_v8 }
  0x25   :  { %351 = vmatpush.bf16.msra.mxu2 %v503_v12 }
  0x26   :  { %365 = vmatpush.bf16.msra.mxu3 %v511_v13 }
  0x90   :  { %v102_v28 = vpop.f32.mrf.mxu0 }
  0x91   :  { %v103_v29 = vadd.f32 %v102_v28, %v40_v26  ;;  %v116_v30 = vpop.f32.mrf.mxu1 }
  0x92   :  { %v117_v31 = vadd.f32 %v116_v30, %v41_v27  ;;  %v180_v30 = vperm.slane %v178_v25, 0 }
  0x94   :  { %v121_v32 = vadd.f32 %v117_v31, %v103_v29 }
  0x96   :  { %122 = vadd.xlane.f32.xlu0 %v121_v32 }
  0x98   :  { %v104_v33 = vpop.f32.mrf.mxu0 }
  0x99   :  { %v105_v34 = vadd.f32 %v104_v33, %v40_v26  ;;  %v118_v35 = vpop.f32.mrf.mxu1  ;;  %v188_v33 = vld [vmem:[%s738_s4] sm:$0x3] }
  0x9a   :  { %v119_v36 = vadd.f32 %v118_v35, %v41_v27  ;;  %v191_v38 = vperm.slane %v188_v33, 1 }
  0x9c   :  { %v124_v37 = vadd.f32 %v119_v36, %v105_v34 }
  0x9e   :  { %125 = vadd.xlane.f32.xlu0 %v124_v37 }
 0x109   :  { %v123_v45 = vpop.xlane.xlu0 %122 }
 0x10a   :  { %v134_v46 = vmul.f32 %v133_v44, %v123_v45 }
 0x10c   :  { %v654_v47 = vsub.f32 %v103_v29, %v134_v46  ;;  %v656_v48 = vsub.f32 %v117_v31, %v134_v46  ;;  %v181_v31 = vperm.slane %v178_v25, 1 }
 0x10e   :  { %v140_v49 = vmul.f32 %v654_v47, %v654_v47  ;;  %v141_v50 = vmul.f32 %v656_v48, %v656_v48 }
 0x110   :  { %v144_v51 = vadd.f32 %v141_v50, %v140_v49 }
 0x111   :  { %v126_v52 = vpop.xlane.xlu0 %125 }
 0x112   :  { %v135_v53 = vmul.f32 %v133_v44, %v126_v52  ;;  %145 = vadd.xlane.f32.xlu1 %v144_v51 }
 0x114   :  { %v662_v54 = vsub.f32 %v105_v34, %v135_v53  ;;  %v664_v55 = vsub.f32 %v119_v36, %v135_v53  ;;  %v190_v36 = vperm.slane %v188_v33, 0 }
 0x116   :  { %v142_v56 = vmul.f32 %v662_v54, %v662_v54  ;;  %v143_v57 = vmul.f32 %v664_v55, %v664_v55 }
 0x118   :  { %v147_v58 = vadd.f32 %v143_v57, %v142_v56 }
 0x11a   :  { %148 = vadd.xlane.f32.xlu1 %v147_v58 }
 0x185   :  { %v146_v9 = vpop.xlane.xlu1 %145 }
 0x186   :  { %v150_v10 = vmul.f32 %v146_v9, %v133_v44 }
 0x188   :  { %v152_v11 = vadd.f32 1e-05, %v150_v10 }
 0x18a   :  { %526 = vrsqrt.f32 %v152_v11  ;;  %vm160_vm3 = vweird.f32 %v152_v11 }
 0x18d   :  { %v149_v14 = vpop.xlane.xlu1 %148 }
 0x18e   :  { %v151_v15 = vmul.f32 %v149_v14, %v133_v44 }
 0x190   :  { %v527_v16 = vpop.eup %526  ;;  %v153_v17 = vadd.f32 1e-05, %v151_v15 }
 0x191   :  { %v155_v18 = vmul.f32 %v527_v16, %v152_v11  ;;  %vm161_vm2 = vweird.f32 %v527_v16 }
 0x192   :  { %528 = vrsqrt.f32 %v153_v17  ;;  %vm162_vm4 = vmor %vm160_vm3, %vm161_vm2  ;;  %vm170_vm6 = vweird.f32 %v153_v17 }
 0x193   :  { %v156_v19 = vmul.f32 %v527_v16, %v155_v18 }
 0x195   :  { %v157_v20 = vmul.f32 0.5, %v156_v19 }
 0x197   :  { %v158_v21 = vsub.f32 1.5, %v157_v20 }
 0x198   :  { %v529_v22 = vpop.eup %528 }
 0x199   :  { %v159_v23 = vmul.f32 %v527_v16, %v158_v21  ;;  %v165_v24 = vmul.f32 %v529_v22, %v153_v17  ;;  %vm171_vm5 = vweird.f32 %v529_v22 }
 0x19a   :  { %vm172_vm7 = vmor %vm170_vm6, %vm171_vm5 }
 0x19b   :  { %v163_v26 = vsel %vm162_vm4, %v527_v16, %v159_v23  ;;  %v166_v27 = vmul.f32 %v529_v22, %v165_v24 }
 0x19c   :  { %v174_v28 = vmul.f32 %v163_v26, %v654_v47  ;;  %v175_v29 = vmul.f32 %v163_v26, %v656_v48 }
 0x19d   :  { %v167_v32 = vmul.f32 0.5, %v166_v27 }
 0x19e   :  { %v184_v35 = vmul.f32 %v180_v30, %v174_v28  ;;  %v185_v37 = vmul.f32 %v181_v31, %v175_v29 }
 0x19f   :  { %v168_v34 = vsub.f32 1.5, %v167_v32 }
 0x1a0   :  { %v194_v43 = vadd.f32 %v190_v36, %v184_v35  ;;  %v195_v44 = vadd.f32 %v191_v38, %v185_v37 }
 0x1a1   :  { %v169_v39 = vmul.f32 %v529_v22, %v168_v34 }
 0x1a2   :  { %v202_v48 = vmul.f32 0.01, %v194_v43  ;;  %v203_v50 = vmul.f32 0.01, %v195_v44  ;;  %vm198_vm8 = vcmp.ge.f32.partialorder %v194_v43, 0.0  ;;  %vm199_vm9 = vcmp.ge.f32.partialorder %v195_v44, 0.0 }
 0x1a3   :  { %v173_v40 = vsel %vm172_vm7, %v529_v22, %v169_v39 }
 0x1a4   :  { %v176_v41 = vmul.f32 %v173_v40, %v662_v54  ;;  %v177_v42 = vmul.f32 %v173_v40, %v664_v55  ;;  %v206_v53 = vsel %vm198_vm8, %v194_v43, %v202_v48  ;;  %v207_v57 = vsel %vm199_vm9, %v195_v44, %v203_v50 }
 0x1a6   :  { %v186_v45 = vmul.f32 %v180_v30, %v176_v41  ;;  %v187_v46 = vmul.f32 %v181_v31, %v177_v42 }
 0x1a8   :  { %v196_v47 = vadd.f32 %v190_v36, %v186_v45  ;;  %v197_v49 = vadd.f32 %v191_v38, %v187_v46 }
 0x1aa   :  { %vm200_vm10 = vcmp.ge.f32.partialorder %v196_v47, 0.0  ;;  %v204_v51 = vmul.f32 0.01, %v196_v47  ;;  %vm201_vm11 = vcmp.ge.f32.partialorder %v197_v49, 0.0  ;;  %v205_v52 = vmul.f32 0.01, %v197_v49 }
 0x1ac   :  { %v208_v56 = vsel %vm200_vm10, %v196_v47, %v204_v51  ;;  %v209_v54 = vsel %vm201_vm11, %v197_v49, %v205_v52 }
 0x1ad   :  { %v210_v58 = vpack.c.bf16 %v208_v56, %v206_v53  ;;  %v211_v55 = vpack.c.bf16 %v209_v54, %v207_v57 }
 0x1af   :  { %352 = vmatmul.bf16.vlgmr.msra.gmra.mxu2 %v210_v58  ;;  %366 = vmatmul.bf16.vlgmr.msra.gmra.mxu3 %v211_v55 }
 0x232   :  { %v353_v60 = vpop.f32.mrf.mxu2  ;;  %v367_v61 = vpop.f32.mrf.mxu3 }
 0x233   :  { %v354_v62 = vadd.f32 %v523_v59, %v353_v60 }
 0x235   :  { %v368_v63 = vadd.f32 %v367_v61, %v354_v62 }
 0x237   :  { %372 = vst [vmem:[#allocation2] sm:$0xff] %v368_v63 }
 0x23a   :  { %v355_v0 = vpop.f32.mrf.mxu2  ;;  %v369_v2 = vpop.f32.mrf.mxu3 }
 0x23b   :  { %v356_v1 = vadd.f32 %v523_v59, %v355_v0 }
 0x23d   :  { %v370_v3 = vadd.f32 %v369_v2, %v356_v1 }
 0x23f   :  { %373 = vst [vmem:[#allocation2 + $0x8] sm:$0xff] %v370_v3 }
 0x240   :  { %386 = dma.vmem_to_hbm [thread:$0]  %s379_s21, 256, %s381_s24, [#allocation3], %s558_s25, %s558_s25, %s559_s6  }
 0x241   :  { %554 = dma.done.wait [#allocation3], 256  }
 0x242   :  { %555 = vsyncadd [#allocation3], 4294967040 }
 0x243   :  { %391 = vsyncpa [#allocation3], 1 }

</bundles_post_ra>
